<compile_context>
chip_gen: v5e
topology: v5e:2x2
jax: 0.10.0
libtpu: 0.0.40
codegen_flags: <defaults>
</compile_context>

<pallas_src>
import functools

import numpy as np
import jax
import jax.numpy as jnp
from jax.experimental import pallas as pl
from jax.experimental.pallas import tpu as pltpu


# ----------------------------- Pallas kernel -------------------------------

def _rmsnorm_kernel(eps, inv_d, x_ref, w_ref, o_ref):
    # x_ref: (TM, D) row tile of the flattened input
    # w_ref: (1, D) weight tile (broadcast over rows)
    x = x_ref[...]
    if x.dtype != jnp.float32:                       # torch: x.float()  (skip no-op cast)
        x = x.astype(jnp.float32)
    ss = jnp.sum(x * x, axis=-1, keepdims=True)      # per-row sum of squares (XLU)
    normed = x * jax.lax.rsqrt(ss * inv_d + eps)     # fold 1/D as a mul; rsqrt on EUP

    y = normed
    if y.dtype != x_ref.dtype:                       # torch: .type_as(x)
        y = y.astype(x_ref.dtype)

    out_dtype = o_ref.dtype                          # torch promotion of `output * weight`
    if y.dtype != out_dtype:
        y = y.astype(out_dtype)
    w = w_ref[...]
    if w.dtype != out_dtype:
        w = w.astype(out_dtype)
    o_ref[...] = y * w


# ----------------------------- tiling helpers --------------------------------

def _sublane_pack(dtype):
    """Sublane packing factor: 8 for 32-bit, 16 for bf16/f16, 32 for int8/fp8."""
    itemsize = np.dtype(dtype).itemsize
    return max(8, 32 // max(1, itemsize))


def _vmem_config():
    """Chip-aware (vmem_limit_bytes, tile-chooser byte budget)."""
    try:
        cap = int(pltpu.get_tpu_info().vmem_capacity_bytes)
    except Exception:
        cap = 64 * 1024 * 1024  # conservative fallback (assume v7x-sized VMEM)
    if cap <= 64 * 1024 * 1024:
        # v7x-class: 64 MiB physical / 32 MiB scoped default -- keep headroom.
        return 32 * 1024 * 1024, 14 * 1024 * 1024
    # v5e / v6e: 128 MiB physical VMEM -- bigger tiles reach the HBM roofline.
    return 96 * 1024 * 1024, 64 * 1024 * 1024


def _choose_row_tile(M, D, x_dtype, out_dtype, budget_bytes, min_steps=4):
    """Largest aligned row tile that fits the budget and keeps a multi-step grid."""
    pack = _sublane_pack(x_dtype)
    if M <= pack:
        return M  # single full-extent block; nothing useful to split

    in_b = np.dtype(x_dtype).itemsize
    out_b = np.dtype(out_dtype).itemsize
    # 2x double-buffered input + output blocks, plus ~3 (TM, D) f32 compute temps.
    bytes_per_row = max(1, D * (2 * in_b + 2 * out_b + 3 * 4))
    tm = budget_bytes // bytes_per_row
    # TODO(synk): if even `pack` rows overflow the budget (very large D), tile D
    # with a second "arbitrary" grid axis and a two-pass sum-of-squares scheme.
    tm = min(tm, 1024)

    # Never collapse to a 1-step grid: keep >= 2-4 steps so the DMA double-buffer
    # overlaps compute and v7x's two TensorCores both get "parallel" work.
    steps = min(min_steps, max(2, M // pack))
    tm = min(tm, pl.cdiv(M, steps))

    tm = max(pack, (tm // pack) * pack)  # dtype-aware sublane alignment
    return tm


# ------------------------------- wrapper --------------------------------------

def pallas_rmsnorm(x, weight, eps=1e-6, block_rows=None):
    """RMSNorm over the last axis of x, scaled by `weight` (shape (D,))."""
    orig_shape = x.shape
    D = int(orig_shape[-1])
    M = 1
    for s in orig_shape[:-1]:
        M *= int(s)
    M = max(M, 1)

    out_dtype = jnp.promote_types(x.dtype, weight.dtype)  # torch `output * weight`

    x2 = x.reshape(M, D)
    w2 = weight.reshape(1, D)

    vmem_limit, budget = _vmem_config()

    if block_rows is None:
        tm = _choose_row_tile(M, D, x2.dtype, out_dtype, budget)
    else:
        pack = _sublane_pack(x2.dtype)
        tm = min(int(block_rows), M)
        if tm < M:
            tm = max(pack, (tm // pack) * pack)

    grid = (pl.cdiv(M, tm),)

    out = pl.pallas_call(
        functools.partial(_rmsnorm_kernel, float(eps), float(1.0 / D)),
        out_shape=jax.ShapeDtypeStruct((M, D), out_dtype),
        grid=grid,
        in_specs=[
            pl.BlockSpec((tm, D), lambda i: (i, 0)),   # row tile of x
            pl.BlockSpec((1, D), lambda i: (0, 0)),    # weight, same block every step
        ],
        out_specs=pl.BlockSpec((tm, D), lambda i: (i, 0)),
        compiler_params=pltpu.CompilerParams(
            dimension_semantics=("parallel",),          # megacore-shard the row axis
            vmem_limit_bytes=vmem_limit,
        ),
    )(x2, w2)
    return out.reshape(orig_shape[:-1] + (D,)).astype(out_dtype)


# ------------------------------ reference -----------------------------------

def rmsnorm_ref(x, weight, eps):
    xf = x.astype(jnp.float32)
    ms = jnp.mean(xf * xf, axis=-1, keepdims=True)
    normed = (xf * jax.lax.rsqrt(ms + eps)).astype(x.dtype)   # .type_as(x)
    return normed * weight                                    # promotes like torch


# --------------------------------- main --------------------------------------

if __name__ == "__main__":
    key = jax.random.PRNGKey(0)
    k1, k2, k3, k4 = jax.random.split(key, 4)
    eps = 1e-6

    # (batch, seq, dim) like the LLaMA module; lane-dense dim (multiple of 128).
    B, S, D = 2, 8, 256
    x = jax.random.normal(k1, (B, S, D), dtype=jnp.float32)
    w = 1.0 + 0.02 * jax.random.normal(k2, (D,), dtype=jnp.float32)
    y = pallas_rmsnorm(x, w, eps)
    jax.block_until_ready(y)
    assert y.shape == x.shape and y.dtype == x.dtype
    assert jnp.allclose(y, rmsnorm_ref(x, w, eps), atol=1e-5, rtol=1e-5)

    # Multi-step grid with a partial last row tile (explicit block_rows override).
    M2, D2 = 200, 384
    x2 = jax.random.normal(k3, (M2, D2), dtype=jnp.float32)
    w2 = jnp.ones((D2,), jnp.float32)
    y2 = pallas_rmsnorm(x2, w2, eps, block_rows=64)
    jax.block_until_ready(y2)
    assert jnp.allclose(y2, rmsnorm_ref(x2, w2, eps), atol=1e-5, rtol=1e-5)

    # Mixed precision: bf16 activations + f32 weight -> f32 output (torch promotion).
    x3 = jax.random.normal(k4, (4, 32, 256), dtype=jnp.bfloat16)
    w3 = 1.0 + 0.02 * jax.random.normal(k2, (256,), dtype=jnp.float32)
    y3 = pallas_rmsnorm(x3, w3, eps)
    jax.block_until_ready(y3)
    assert y3.dtype == jnp.float32
    assert jnp.allclose(y3, rmsnorm_ref(x3, w3, eps), atol=2e-2, rtol=2e-2)

    print("KERNEL_OK")
</pallas_src>

<mosaic_0001>
module attributes {stable_mosaic.version = 11 : i64} {
  func.func @_rmsnorm_kernel(%arg0: i32, %arg1: memref<8x256xf32, #tpu.memory_space<vmem>>, %arg2: memref<1x256xf32, #tpu.memory_space<vmem>>, %arg3: memref<8x256xf32, #tpu.memory_space<vmem>>) attributes {dimension_semantics = [#tpu.dimension_semantics<parallel>], iteration_bounds = array<i64: 2>, scalar_prefetch = 0 : i64, scratch_operands = 0 : i64, tpu.core_type = #tpu.core_type<tc>, window_params = [{transform_indices = @transform_0, window_bounds = array<i64: 8, 256>}, {pipeline_mode = #tpu.pipeline_mode<synchronous>, transform_indices = @transform_1, window_bounds = array<i64: 1, 256>}, {transform_indices = @transform_2, window_bounds = array<i64: 8, 256>}]} {
    %c0 = arith.constant 0 : index
    %c0_0 = arith.constant 0 : index
    %0 = vector.load %arg1[%c0, %c0_0] : memref<8x256xf32, #tpu.memory_space<vmem>>, vector<8x256xf32>
    %1 = arith.mulf %0, %0 : vector<8x256xf32>
    %cst = arith.constant dense<0.000000e+00> : vector<8xf32>
    %2 = vector.multi_reduction <add>, %1, %cst [1] : vector<8x256xf32> to vector<8xf32>
    %3 = vector.shape_cast %2 : vector<8xf32> to vector<8x1xf32>
    %cst_1 = arith.constant 3.906250e-03 : f32
    %4 = vector.broadcast %cst_1 : f32 to vector<8x1xf32>
    %5 = arith.mulf %3, %4 : vector<8x1xf32>
    %cst_2 = arith.constant 9.99999997E-7 : f32
    %6 = vector.broadcast %cst_2 : f32 to vector<8x1xf32>
    %7 = arith.addf %5, %6 : vector<8x1xf32>
    %8 = math.rsqrt %7 : vector<8x1xf32>
    %9 = vector.broadcast %8 : vector<8x1xf32> to vector<8x256xf32>
    %10 = arith.mulf %0, %9 : vector<8x256xf32>
    %c0_3 = arith.constant 0 : index
    %c0_4 = arith.constant 0 : index
    %11 = vector.load %arg2[%c0_3, %c0_4] : memref<1x256xf32, #tpu.memory_space<vmem>>, vector<1x256xf32>
    %12 = vector.broadcast %11 : vector<1x256xf32> to vector<8x256xf32>
    %13 = arith.mulf %10, %12 : vector<8x256xf32>
    %c0_5 = arith.constant 0 : index
    %c0_6 = arith.constant 0 : index
    %14 = vector.load %arg3[%c0_5, %c0_6] : memref<8x256xf32, #tpu.memory_space<vmem>>, vector<8x256xf32>
    tpu.vector_store %arg3[%c0_5, %c0_6], %13 {strides = array<i32>} : memref<8x256xf32, #tpu.memory_space<vmem>>, vector<8x256xf32>,
    return
  }
  func.func @transform_0(%arg0: i32) -> (i32, i32) {
    %c0_i32 = arith.constant 0 : i32
    %c0_i32_0 = arith.constant 0 : i32
    return %arg0, %c0_i32 : i32, i32
  }
  func.func @transform_1(%arg0: i32) -> (i32, i32) {
    %c0_i32 = arith.constant 0 : i32
    %c0_i32_0 = arith.constant 0 : i32
    %c0_i32_1 = arith.constant 0 : i32
    return %c0_i32, %c0_i32_0 : i32, i32
  }
  func.func @transform_2(%arg0: i32) -> (i32, i32) {
    %c0_i32 = arith.constant 0 : i32
    %c0_i32_0 = arith.constant 0 : i32
    return %arg0, %c0_i32 : i32, i32
  }
}

</mosaic_0001>

<bundles_post_ra>
// kernel: tpu_custom_call.1
= control target key start
LH: loop header
LB: loop body
LE: loop exit
PB: predicated region body
PF: predicated region fallthrough
CT: control target
= control target key end

     0   :  { %7 = vsyncpa [#allocation3], 0  ;;  %s672_s0 = inlined_call_operand.hbm [shape: f32[16,256], index: 0, kind: input, shape index: {}]   ;;  %s673_s1 = inlined_call_operand.hbm [shape: f32[1,256], index: 1, kind: input, shape index: {}]   ;;  %s674_s2 = inlined_call_operand.hbm [shape: f32[16,256], index: 2, kind: output, shape index: {}]  }
   0x1   :  { %9 = vsyncpa [#allocation3 + $0x1], 0 }
   0x2   :  { %10 = vsyncpa [#allocation6], 0 }
   0x3   :  { %11 = vsyncpa [#allocation4], 0 }
   0x4   :  { %13 = vsyncpa [#allocation4 + $0x1], 0  ;;  %s530_s9 = smov 0   ;;  %s532_s10 = smov 0  }
   0x5   :  { %s534_s11 = smov 0   ;;  %s536_s12 = smov 0  }
   0x6 LB: > { %s551_s13 = sadd.s32 4294967295, %s512_s12   ;;  %s305_s14 = sadd.s32 4294967294, %s512_s12   ;;  %s512_s12 = sphi %s536_s12, %s684_s12   ;;  %s508_s11 = sphi %s534_s11, %s683_s11   ;;  %s504_s10 = sphi %s532_s10, %s682_s10   ;;  %s500_s9 = sphi %s530_s9, %s681_s9  }
   0x7   : > { %p39_p0 = scmp.ne.s32.totalorder %s504_s10, %s500_s9  ;;  %p40_p1 = scmp.eq.s32.totalorder %s551_s13, 0 }
   0x8   : > { %p84_p2 = scmp.eq.s32.totalorder %s551_s13, 1  ;;  %p90_p3 = scmp.eq.s32.totalorder %s305_s14, 1 }
   0x9   : > { %p560_p4 = por %p40_p1, %p39_p0  ;;  %p306_p5 = scmp.ge.s32.totalorder %s512_s12, 1 }
   0xa   : > { %p565_p6 = por %p90_p3, %p39_p0  ;;  %p97_p7 = scmp.lt.s32.totalorder %s512_s12, 3 }
   0xb   : > { %s109_s19 = sshll.u32 %s673_s1, 4  ;;  %s514_s21 = smov [#allocation5]   ;;  %s110_s19 = int_to_ptr.hbm [resolvable:$true] %s109_s19 }
   0xc   : > { %p573_p8 = pnand %p306_p5, %p97_p7  ;;  %s111_s22 = sshll.u32 %s514_s21, 4  ;;  %s112_s22 = int_to_ptr.vmem [resolvable:$true] %s111_s22 }
   0xd   : > { %s583_s23 = sadd.s32 1, %s512_s12   ;;  %s26_s24 = sadd.s32 1, %s508_s11 }
   0xe   : > { %p331_p10 = pneg %p573_p8  ;;  %s23_s25 = ssub.s32 %s512_s12, %s583_s23 }
   0xf   : > { %p24_p12 = scmp.eq.s32.totalorder %s23_s25, 0  ;;  %p33_p13 = scmp.ne.s32.totalorder %s508_s11, %s504_s10 }
  0x10   : > { %p332_p11 = pnand %p331_p10, %p40_p1  ;;  %p34_p0 = scmp.eq.s32.totalorder %s512_s12, 0 }
  0x11   : > { %s592_s26 = scalar_select %p24_p12, %s508_s11, %s26_s24  }
  0x12   : > { %334 = dma.hbm_to_vmem [thread:$0]  (!%p332_p11), %s110_s19, 32, %s112_s22, [#allocation6]  }
  0x13   : > { %p596_p3 = por %p84_p2, %p33_p13  ;;  %p344_p5 = scmp.lt.s32.totalorder %s512_s12, 2 }
  0x14   : > { %s122_s28 = sand.u32 1, %s508_s11   ;;  %s321_s29 = sshll.u32 %s512_s12, 4 }
  0x15   : > { %p35_p7 = por %p34_p0, %p33_p13  ;;  %s309_s30 = sshll.u32 %s122_s28, 4 }
  0x16   : > { %s131_s5 = scalar_lea.hbm %s672_s0, %s321_s29  ;;  %s126_s7 = scalar_lea.vmem [#allocation2], %s309_s30 }
  0x17   : > { %s133_s6 = sshll.u32 %s131_s5, 4  ;;  %s135_s8 = sshll.u32 %s126_s7, 4  ;;  %s134_s6 = int_to_ptr.hbm [resolvable:$true] %s133_s6  ;;  %s136_s8 = int_to_ptr.vmem [resolvable:$true] %s135_s8 }
  0x18   : > { %p606_p10 = pnand %p344_p5, %p35_p7  ;;  %s123_s17 = scalar_lea.sflag [#allocation3], %s122_s28 }
  0x19   : > { %s412_s18 = sshra.s32 %s134_s6, 4  ;;  %s419_s24 = scalar_lea.hbm %s672_s0, 32  ;;  %s413_s18 = int_to_ptr.hbm [resolvable:$true] %s412_s18 }
  0x1a   : > { %s414_s19 = scalar_lea.hbm %s413_s18, 16  ;;  %p416_p11 = pneg %p606_p10 }
  0x1b   : > { %p415_p2 = scmp.ne.s32.totalorder %s413_s18, %s414_s19  ;;  %p420_p0 = scmp.lt.s32.totalorder %s413_s18, %s672_s0 }
  0x1c   : > { %p421_p5 = scmp.lt.s32.totalorder %s419_s24, %s414_s19 }
  0x1d   : > { %p417_p12 = pnand %p416_p11, %p415_p2 }
  0x1e   : > { %p422_p7 = por %p421_p5, %p420_p0 }
  0x1f   : > { %p418_p13 = pneg %p417_p12 }
  0x21   : > { %p423_p9 = pnand %p422_p7, %p418_p13 }
  0x23   : > { %426 = shalt.err (!%p423_p9)
}
  0x24   : > { %338 = dma.hbm_to_vmem [thread:$0]  (!%p606_p10), %s134_s6, 256, %s136_s8, %s123_s17  }
  0x25   : > { %144 = sbr.rel (%p573_p8) target bundleno = 196 (0xc4), region = 28  ;;  %s623_s28 = sand.u32 (!%p573_p8), 1, %s504_s10  }
  0x26   : > { %s313_s30 = sshll.u32 (!%p573_p8), %s623_s28, 4  ;;  %s147_s3 = scalar_lea.sflag (!%p573_p8), [#allocation3], %s623_s28 }
  0x27   : > { %s150_s4 = scalar_lea.vmem (!%p573_p8), [#allocation2], %s313_s30 }
  0x2a   : > { %487 = dma.done.wait (%p560_p4), %s147_s3, 256  }
  0x2b   : > { %489 = vsyncadd (%p560_p4), %s147_s3, 4294967040 }
  0x2c   : > { %491 = dma.done.wait (%p40_p1), [#allocation6], 32  }
  0x2d   : > { %493 = vsyncadd (%p40_p1), [#allocation6], 4294967264  ;;  %v177_v0 = vld [vmem:[%s150_s4] sm:$0xff]  ;;  %v178_v1 = vld [vmem:[%s150_s4 + $0x8] sm:$0xff]  ;;  %s322_s15 = sshll.u32 %s551_s13, 4  ;;  %s176_s7 = scalar_lea.vmem [#allocation7], %s313_s30 }
  0x2e   : > { %v179_v2 = vmul.f32 %v177_v0, %v177_v0  ;;  %v180_v3 = vmul.f32 %v178_v1, %v178_v1  ;;  %v198_v13 = vld [vmem:[#allocation5] sm:$0x3]  ;;  %s220_s6 = scalar_lea.hbm %s674_s2, %s322_s15  ;;  %s222_s13 = sshll.u32 %s176_s7, 4  ;;  %s223_s13 = int_to_ptr.vmem [resolvable:$true] %s222_s13 }
  0x2f   : > { %v200_v15 = vperm.slane %v198_v13, 0  ;;  %v201_v16 = vperm.slane %v198_v13, 1  ;;  %s224_s8 = sshll.u32 %s220_s6, 4  ;;  %s209_s14 = scalar_lea.sflag [#allocation4], %s623_s28  ;;  %s225_s8 = int_to_ptr.hbm [resolvable:$true] %s224_s8 }
  0x30   : > { %v181_v4 = vadd.f32 %v180_v3, %v179_v2  ;;  %s456_s17 = sshra.s32 %s225_s8, 4  ;;  %s462_s22 = scalar_lea.hbm %s674_s2, 32  ;;  %s457_s17 = int_to_ptr.hbm [resolvable:$true] %s456_s17 }
  0x31   : > { %s458_s18 = scalar_lea.hbm %s457_s17, 16  ;;  %p463_p9 = scmp.lt.s32.totalorder %s457_s17, %s674_s2 }
  0x32   : > { %182 = vadd.xlane.f32.xlu0 %v181_v4  ;;  %p459_p1 = scmp.ne.s32.totalorder %s457_s17, %s458_s18  ;;  %p464_p10 = scmp.lt.s32.totalorder %s462_s22, %s458_s18 }
  0x34   : > { %p460_p4 = pnand %p459_p1, %p596_p3  ;;  %p465_p2 = por %p464_p10, %p463_p9 }
  0x36   : > { %p461_p8 = pneg %p460_p4 }
  0x38   : > { %p466_p11 = pnand %p465_p2, %p461_p8 }
  0xa5   : > { %v183_v5 = vpop.xlane.xlu0 %182 }
  0xa6   : > { %v184_v6 = vmul.f32 0.00390625, %v183_v5 }
  0xa8   : > { %v185_v7 = vadd.f32 1e-06, %v184_v6 }
  0xaa   : > { %380 = vrsqrt.f32 %v185_v7  ;;  %vm192_vm1 = vweird.f32 %v185_v7 }
  0xb0   : > { %v381_v8 = vpop.eup %380 }
  0xb1   : > { %v187_v9 = vmul.f32 %v381_v8, %v185_v7  ;;  %vm193_vm0 = vweird.f32 %v381_v8 }
  0xb2   : > { %vm194_vm2 = vmor %vm192_vm1, %vm193_vm0 }
  0xb3   : > { %v188_v10 = vmul.f32 %v381_v8, %v187_v9 }
  0xb5   : > { %v189_v11 = vmul.f32 0.5, %v188_v10 }
  0xb7   : > { %v190_v12 = vsub.f32 1.5, %v189_v11 }
  0xb9   : > { %v191_v14 = vmul.f32 %v381_v8, %v190_v12 }
  0xbb   : > { %v195_v17 = vsel %vm194_vm2, %v381_v8, %v191_v14 }
  0xbc   : > { %v196_v18 = vmul.f32 %v195_v17, %v177_v0  ;;  %v197_v19 = vmul.f32 %v195_v17, %v178_v1 }
  0xbe   : > { %v204_v20 = vmul.f32 %v200_v15, %v196_v18  ;;  %v205_v21 = vmul.f32 %v201_v16, %v197_v19 }
  0xc0   : > { %206 = vst [vmem:[%s176_s7] sm:$0xff] %v204_v20 }
  0xc1   : > { %207 = vst [vmem:[%s176_s7 + $0x8] sm:$0xff] %v205_v21 }
  0xc2   : > { %469 = shalt.err (!%p466_p11)
}
  0xc3   : > { %329 = dma.vmem_to_hbm [thread:$0]  (%p596_p3), %s223_s13, 256, %s225_s8, %s209_s14  }
  0xc4 PF: > { %s236_s29 = sand.u32 1, %s500_s9   ;;  %p680_p12 = scmp.ge.s32.totalorder %s512_s12, 2 }
  0xc5   : > { %s237_s28 = scalar_lea.sflag [#allocation4], %s236_s29 }
  0xc6   : > { %p340_p13 = pnand %p680_p12, %p565_p6 }
  0xc8   : > { %p341_p0 = pneg %p340_p13 }
  0xca   : > { %495 = dma.done.wait (%p341_p0), %s237_s28, 256  }
  0xcb   : > { %497 = vsyncadd (%p341_p0), %s237_s28, 4294967040  ;;  %p16_p5 = scmp.ge.s32.totalorder %s583_s23, 4   ;;  %s681_s9 = smov %s504_s10 }
  0xcc   : > { %s682_s10 = smov %s508_s11  ;;  %s683_s11 = smov %s592_s26 }
  0xcd   : > { %s684_s12 = smov %s583_s23  ;;  %18 = sbr.rel (!%p16_p5) target bundleno = 6 (0x6), region = 77 }
  0xd2   :  { %243 = vsyncpa [#allocation3], 1 }
  0xd3   :  { %245 = vsyncpa [#allocation3 + $0x1], 1 }
  0xd4   :  { %246 = vsyncpa [#allocation6], 1 }
  0xd5   :  { %247 = vsyncpa [#allocation4], 1 }
  0xd6   :  { %249 = vsyncpa [#allocation4 + $0x1], 1 }

</bundles_post_ra>
